<compile_context>
chip_gen: v6e
topology: v6e:2x2x1
jax: 0.10.0
libtpu: 0.0.40
codegen_flags: <defaults>
</compile_context>

<pallas_src>
import functools
import math

import jax
import jax.numpy as jnp
from jax.experimental import pallas as pl
from jax.experimental.pallas import tpu as pltpu


CFG = dict(
    vocab_size=128,
    type_vocab_size=2,
    max_position=32,
    hidden=128,
    heads=4,
    intermediate=256,
    layers=2,
)

_LN_EPS = 1e-12
_CLS_PAD = 128   # pad the 1-wide classifier output to a lane-dense 128


# --------------------------- in-kernel helpers -------------------------------

def _layernorm_f32(h, g, b, eps):
    mu = jnp.mean(h, axis=-1, keepdims=True)
    var = jnp.mean((h - mu) * (h - mu), axis=-1, keepdims=True)
    return (h - mu) * jax.lax.rsqrt(var + eps) * g + b


def _gelu_tanh(y):
    # TODO(synk): HF BERT default is erf-GELU; tanh approximation used (~1e-3 rel diff).
    c = math.sqrt(2.0 / math.pi)
    return 0.5 * y * (1.0 + jnp.tanh(c * (y + 0.044715 * y * y * y)))


# ----------------------------- Pallas kernels --------------------------------

def _emb_ln_kernel(x_ref, g_ref, b_ref, o_ref, *, eps):
    x = x_ref[...].astype(jnp.float32)
    o_ref[...] = _layernorm_f32(x, g_ref[...], b_ref[...], eps).astype(o_ref.dtype)


def embed_layernorm(x, gamma, beta, B, S):
    """LayerNorm-only (no residual) over [B*S, H]; grid over batch, bf16 out."""
    M, H = x.shape
    return pl.pallas_call(
        functools.partial(_emb_ln_kernel, eps=_LN_EPS),
        out_shape=jax.ShapeDtypeStruct((M, H), jnp.bfloat16),
        grid=(B,),
        in_specs=[
            pl.BlockSpec((S, H), lambda b: (b, 0)),
            pl.BlockSpec((1, H), lambda b: (0, 0)),
            pl.BlockSpec((1, H), lambda b: (0, 0)),
        ],
        out_specs=pl.BlockSpec((S, H), lambda b: (b, 0)),
        compiler_params=pltpu.CompilerParams(dimension_semantics=("parallel",)),
    )(x, gamma, beta)


def _encoder_layer_kernel(x_ref, mask_ref,
                          wqkv_ref, bqkv_ref, wo_ref, bo_ref, g1_ref, b1_ref,
                          wi_ref, bi_ref, wo2_ref, bo2_ref, g2_ref, b2_ref,
                          o_ref, *, nh, dh, scale, eps):
    H = nh * dh
    x_bf = x_ref[...]                                # (S, H) bf16
    mask = mask_ref[0]                               # (1, S) additive, f32

    # ---- fused QKV projection: one [S,H] x [H,3H] MXU matmul, f32 accumulate ----
    qkv = jnp.dot(x_bf, wqkv_ref[...], preferred_element_type=jnp.float32)
    qkv = qkv + bqkv_ref[...]
    q = (qkv[:, 0:H] * scale).astype(jnp.bfloat16)   # fold 1/sqrt(dh) into Q
    k = qkv[:, H:2 * H].astype(jnp.bfloat16)
    v = qkv[:, 2 * H:3 * H].astype(jnp.bfloat16)

    # ---- attention: all heads inside one kernel invocation, static unrolled loop;
    #      scores via dot_general contracting last axes (no explicit k.T) ----
    ctx_heads = []
    for h in range(nh):
        qh = q[:, h * dh:(h + 1) * dh]
        kh = k[:, h * dh:(h + 1) * dh]
        vh = v[:, h * dh:(h + 1) * dh]
        s = jax.lax.dot_general(qh, kh, (((1,), (1,)), ((), ())),
                                preferred_element_type=jnp.float32)   # (S, S)
        s = s + mask
        s = s - jnp.max(s, axis=-1, keepdims=True)
        p = jnp.exp(s)
        p = p * pl.reciprocal(jnp.sum(p, axis=-1, keepdims=True), approx=True)
        ctx_heads.append(jnp.dot(p.astype(jnp.bfloat16), vh,
                                 preferred_element_type=jnp.float32))
    ctx = jnp.concatenate(ctx_heads, axis=-1).astype(jnp.bfloat16)    # (S, H)

    # ---- attention output projection + residual + LayerNorm (fused) ----
    attn = jnp.dot(ctx, wo_ref[...], preferred_element_type=jnp.float32) + bo_ref[...]
    h1 = _layernorm_f32(attn + x_bf.astype(jnp.float32), g1_ref[...], b1_ref[...], eps)
    h1_bf = h1.astype(jnp.bfloat16)

    # ---- FFN: GELU intermediate + output projection + residual + LayerNorm (fused) ----
    inter = jnp.dot(h1_bf, wi_ref[...], preferred_element_type=jnp.float32) + bi_ref[...]
    inter = _gelu_tanh(inter).astype(jnp.bfloat16)
    ffn = jnp.dot(inter, wo2_ref[...], preferred_element_type=jnp.float32) + bo2_ref[...]
    h2 = _layernorm_f32(ffn + h1, g2_ref[...], b2_ref[...], eps)
    o_ref[...] = h2.astype(o_ref.dtype)


def encoder_layer(x, mask, L, B, S, H, I, nh, dh):
    """Whole BERT encoder layer as a single pallas_call; grid over batch (parallel)."""
    full2 = lambda shape: pl.BlockSpec(shape, lambda b: (0, 0))
    return pl.pallas_call(
        functools.partial(_encoder_layer_kernel, nh=nh, dh=dh,
                          scale=1.0 / math.sqrt(dh), eps=_LN_EPS),
        out_shape=jax.ShapeDtypeStruct((B * S, H), jnp.bfloat16),
        grid=(B,),
        in_specs=[
            pl.BlockSpec((S, H), lambda b: (b, 0)),        # x (per-batch rows)
            pl.BlockSpec((1, 1, S), lambda b: (b, 0, 0)),  # additive mask [B,1,S]
            full2((H, 3 * H)), full2((1, 3 * H)),          # wqkv, bqkv
            full2((H, H)), full2((1, H)),                  # wo, bo
            full2((1, H)), full2((1, H)),                  # ln1 gamma, beta
            full2((H, I)), full2((1, I)),                  # wi, bi
            full2((I, H)), full2((1, H)),                  # wo2, bo2
            full2((1, H)), full2((1, H)),                  # ln2 gamma, beta
        ],
        out_specs=pl.BlockSpec((S, H), lambda b: (b, 0)),
        compiler_params=pltpu.CompilerParams(dimension_semantics=("parallel",)),
    )(x, mask, L["wqkv"], L["bqkv"], L["wo"], L["bo"], L["ln1_g"], L["ln1_b"],
      L["wi"], L["bi"], L["wo2"], L["bo2"], L["ln2_g"], L["ln2_b"])


def _pool_cls_kernel(x_ref, pw_ref, pb_ref, cw_ref, cb_ref, o_ref):
    pooled = jnp.dot(x_ref[...], pw_ref[...],
                     preferred_element_type=jnp.float32) + pb_ref[...]
    pooled = jnp.tanh(pooled).astype(jnp.bfloat16)
    # dropout is identity at inference time
    o_ref[...] = jnp.dot(pooled, cw_ref[...],
                         preferred_element_type=jnp.float32) + cb_ref[...]


def pooler_classifier(x, pw, pb, cw, cb):
    """Fused pooler (dense+tanh) + classifier; lane-dense padded output [B, _CLS_PAD]."""
    B, H = x.shape
    N = cw.shape[1]
    full2 = lambda shape: pl.BlockSpec(shape, lambda i: (0, 0))
    return pl.pallas_call(
        _pool_cls_kernel,
        out_shape=jax.ShapeDtypeStruct((B, N), jnp.float32),
        grid=(1,),
        in_specs=[full2((B, H)), full2((H, H)), full2((1, H)),
                  full2((H, N)), full2((1, N))],
        out_specs=full2((B, N)),
        compiler_params=pltpu.CompilerParams(dimension_semantics=("arbitrary",)),
    )(x, pw, pb, cw, cb)


# ----------------------------- model definition ------------------------------

def init_params(key, cfg):
    H, I = cfg["hidden"], cfg["intermediate"]

    def nrm(k, shape):
        return (0.02 * jax.random.normal(k, shape)).astype(jnp.float32)

    keys = iter(jax.random.split(key, 64))
    p = {
        "word_emb": nrm(next(keys), (cfg["vocab_size"], H)),
        "pos_emb": nrm(next(keys), (cfg["max_position"], H)),
        "type_emb": nrm(next(keys), (cfg["type_vocab_size"], H)),
        "emb_ln_g": jnp.ones((H,), jnp.float32),
        "emb_ln_b": jnp.zeros((H,), jnp.float32),
        "pool_w": nrm(next(keys), (H, H)),
        "pool_b": jnp.zeros((H,), jnp.float32),
        "cls_w": nrm(next(keys), (H, 1)),
        "cls_b": jnp.zeros((1,), jnp.float32),
        "layers": [],
    }
    for _ in range(cfg["layers"]):
        layer = {
            "q_w": nrm(next(keys), (H, H)), "q_b": jnp.zeros((H,), jnp.float32),
            "k_w": nrm(next(keys), (H, H)), "k_b": jnp.zeros((H,), jnp.float32),
            "v_w": nrm(next(keys), (H, H)), "v_b": jnp.zeros((H,), jnp.float32),
            "o_w": nrm(next(keys), (H, H)), "o_b": jnp.zeros((H,), jnp.float32),
            "ln1_g": jnp.ones((H,), jnp.float32), "ln1_b": jnp.zeros((H,), jnp.float32),
            "i_w": nrm(next(keys), (H, I)), "i_b": jnp.zeros((I,), jnp.float32),
            "o2_w": nrm(next(keys), (I, H)), "o2_b": jnp.zeros((H,), jnp.float32),
            "ln2_g": jnp.ones((H,), jnp.float32), "ln2_b": jnp.zeros((H,), jnp.float32),
        }
        p["layers"].append(layer)
    return p


def prepare_params(p):
    """Cast weights to bf16, fuse Q/K/V, reshape biases/LN params to [1,N],
    pad the 1-wide classifier to a lane-dense 128-wide matmul."""
    w = lambda a: a.astype(jnp.bfloat16)
    row = lambda a: a.reshape(1, -1).astype(jnp.float32)

    H = p["pool_w"].shape[0]
    cls_w_pad = jnp.zeros((H, _CLS_PAD), jnp.float32).at[:, :1].set(p["cls_w"])
    cls_b_pad = jnp.zeros((_CLS_PAD,), jnp.float32).at[:1].set(p["cls_b"])

    out = {
        "word_emb": p["word_emb"], "pos_emb": p["pos_emb"], "type_emb": p["type_emb"],
        "emb_ln_g": row(p["emb_ln_g"]), "emb_ln_b": row(p["emb_ln_b"]),
        "pool_w": w(p["pool_w"]), "pool_b": row(p["pool_b"]),
        "cls_w": w(cls_w_pad), "cls_b": row(cls_b_pad),
        "layers": [],
    }
    for L in p["layers"]:
        out["layers"].append({
            "wqkv": w(jnp.concatenate([L["q_w"], L["k_w"], L["v_w"]], axis=1)),
            "bqkv": row(jnp.concatenate([L["q_b"], L["k_b"], L["v_b"]], axis=0)),
            "wo": w(L["o_w"]), "bo": row(L["o_b"]),
            "ln1_g": row(L["ln1_g"]), "ln1_b": row(L["ln1_b"]),
            "wi": w(L["i_w"]), "bi": row(L["i_b"]),
            "wo2": w(L["o2_w"]), "bo2": row(L["o2_b"]),
            "ln2_g": row(L["ln2_g"]), "ln2_b": row(L["ln2_b"]),
        })
    return out


def bert_for_sequence_classification(params, input_ids, attention_mask,
                                     token_type_ids, cfg=CFG):
    B, S = input_ids.shape
    H, nh, I = cfg["hidden"], cfg["heads"], cfg["intermediate"]
    dh = H // nh

    # ---- embeddings (gather is JAX glue; LayerNorm-only Pallas kernel) ----
    pos_ids = jnp.arange(S, dtype=jnp.int32)
    emb = (params["word_emb"][input_ids]
           + params["pos_emb"][pos_ids][None, :, :]
           + params["type_emb"][token_type_ids]).astype(jnp.float32)
    x = embed_layernorm(emb.reshape(B * S, H),
                        params["emb_ln_g"], params["emb_ln_b"], B, S)   # bf16 [B*S, H]

    # ---- additive attention mask, stored once as [B, 1, S] (no per-head replication) ----
    mask = ((1.0 - attention_mask.astype(jnp.float32)) * -10000.0).reshape(B, 1, S)

    # ---- encoder stack: one fused Pallas kernel per layer ----
    for L in params["layers"]:
        x = encoder_layer(x, mask, L, B, S, H, I, nh, dh)

    # ---- pooler + classifier (fused kernel, lane-dense padded output) ----
    first_tok = x.reshape(B, S, H)[:, 0, :]                              # [B, H] bf16
    # TODO(synk): training-mode dropout RNG not implemented (inference semantics).
    logits_pad = pooler_classifier(first_tok, params["pool_w"], params["pool_b"],
                                   params["cls_w"], params["cls_b"])     # [B, 128] f32
    return logits_pad[:, :1]                                             # [B, 1]


# --------------------------------- main ---------------------------------------

if __name__ == "__main__":
    key = jax.random.PRNGKey(0)
    pkey, ikey = jax.random.split(key)

    B, S = 2, 8
    raw_params = init_params(pkey, CFG)
    params = prepare_params(raw_params)

    input_ids = jax.random.randint(ikey, (B, S), 0, CFG["vocab_size"], dtype=jnp.int32)
    attention_mask = jnp.ones((B, S), jnp.int32).at[1, 6:].set(0)  # pad last 2 tokens of batch 1
    token_type_ids = jnp.zeros((B, S), jnp.int32)

    logits = bert_for_sequence_classification(params, input_ids, attention_mask, token_type_ids)
    logits = jax.block_until_ready(logits)

    assert logits.shape == (B, 1) and logits.dtype == jnp.float32
    print("KERNEL_OK")
</pallas_src>

<mosaic_0001>
module attributes {stable_mosaic.version = 11 : i64} {
  func.func @_emb_ln_kernel(%arg0: i32, %arg1: memref<8x128xf32, #tpu.memory_space<vmem>>, %arg2: memref<1x128xf32, #tpu.memory_space<vmem>>, %arg3: memref<1x128xf32, #tpu.memory_space<vmem>>, %arg4: memref<8x128xbf16, #tpu.memory_space<vmem>>) attributes {dimension_semantics = [#tpu.dimension_semantics<parallel>], iteration_bounds = array<i64: 2>, scalar_prefetch = 0 : i64, scratch_operands = 0 : i64, tpu.core_type = #tpu.core_type<tc>, window_params = [{transform_indices = @transform_0, window_bounds = array<i64: 8, 128>}, {pipeline_mode = #tpu.pipeline_mode<synchronous>, transform_indices = @transform_1, window_bounds = array<i64: 1, 128>}, {pipeline_mode = #tpu.pipeline_mode<synchronous>, transform_indices = @transform_2, window_bounds = array<i64: 1, 128>}, {transform_indices = @transform_3, window_bounds = array<i64: 8, 128>}]} {
    %c0 = arith.constant 0 : index
    %c0_0 = arith.constant 0 : index
    %0 = vector.load %arg1[%c0, %c0_0] : memref<8x128xf32, #tpu.memory_space<vmem>>, vector<8x128xf32>
    %c0_1 = arith.constant 0 : index
    %c0_2 = arith.constant 0 : index
    %1 = vector.load %arg2[%c0_1, %c0_2] : memref<1x128xf32, #tpu.memory_space<vmem>>, vector<1x128xf32>
    %c0_3 = arith.constant 0 : index
    %c0_4 = arith.constant 0 : index
    %2 = vector.load %arg3[%c0_3, %c0_4] : memref<1x128xf32, #tpu.memory_space<vmem>>, vector<1x128xf32>
    %cst = arith.constant dense<0.000000e+00> : vector<8xf32>
    %3 = vector.multi_reduction <add>, %0, %cst [1] : vector<8x128xf32> to vector<8xf32>
    %4 = vector.shape_cast %3 : vector<8xf32> to vector<8x1xf32>
    %cst_5 = arith.constant 1.280000e+02 : f32
    %5 = vector.broadcast %cst_5 : f32 to vector<8x1xf32>
    %6 = arith.divf %4, %5 : vector<8x1xf32>
    %7 = vector.broadcast %6 : vector<8x1xf32> to vector<8x128xf32>
    %8 = arith.subf %0, %7 : vector<8x128xf32>
    %9 = vector.broadcast %6 : vector<8x1xf32> to vector<8x128xf32>
    %10 = arith.subf %0, %9 : vector<8x128xf32>
    %11 = arith.mulf %8, %10 : vector<8x128xf32>
    %cst_6 = arith.constant dense<0.000000e+00> : vector<8xf32>
    %12 = vector.multi_reduction <add>, %11, %cst_6 [1] : vector<8x128xf32> to vector<8xf32>
    %13 = vector.shape_cast %12 : vector<8xf32> to vector<8x1xf32>
    %cst_7 = arith.constant 1.280000e+02 : f32
    %14 = vector.broadcast %cst_7 : f32 to vector<8x1xf32>
    %15 = arith.divf %13, %14 : vector<8x1xf32>
    %16 = vector.broadcast %6 : vector<8x1xf32> to vector<8x128xf32>
    %17 = arith.subf %0, %16 : vector<8x128xf32>
    %cst_8 = arith.constant 9.99999996E-13 : f32
    %18 = vector.broadcast %cst_8 : f32 to vector<8x1xf32>
    %19 = arith.addf %15, %18 : vector<8x1xf32>
    %20 = math.rsqrt %19 : vector<8x1xf32>
    %21 = vector.broadcast %20 : vector<8x1xf32> to vector<8x128xf32>
    %22 = arith.mulf %17, %21 : vector<8x128xf32>
    %23 = vector.broadcast %1 : vector<1x128xf32> to vector<8x128xf32>
    %24 = arith.mulf %22, %23 : vector<8x128xf32>
    %25 = vector.broadcast %2 : vector<1x128xf32> to vector<8x128xf32>
    %26 = arith.addf %24, %25 : vector<8x128xf32>
    %27 = arith.truncf %26 : vector<8x128xf32> to vector<8x128xbf16>
    %c0_9 = arith.constant 0 : index
    %c0_10 = arith.constant 0 : index
    %28 = vector.load %arg4[%c0_9, %c0_10] : memref<8x128xbf16, #tpu.memory_space<vmem>>, vector<8x128xbf16>
    tpu.vector_store %arg4[%c0_9, %c0_10], %27 {strides = array<i32>} : memref<8x128xbf16, #tpu.memory_space<vmem>>, vector<8x128xbf16>,
    return
  }
  func.func @transform_0(%arg0: i32) -> (i32, i32) {
    %c0_i32 = arith.constant 0 : i32
    %c0_i32_0 = arith.constant 0 : i32
    return %arg0, %c0_i32 : i32, i32
  }
  func.func @transform_1(%arg0: i32) -> (i32, i32) {
    %c0_i32 = arith.constant 0 : i32
    %c0_i32_0 = arith.constant 0 : i32
    %c0_i32_1 = arith.constant 0 : i32
    return %c0_i32, %c0_i32_0 : i32, i32
  }
  func.func @transform_2(%arg0: i32) -> (i32, i32) {
    %c0_i32 = arith.constant 0 : i32
    %c0_i32_0 = arith.constant 0 : i32
    %c0_i32_1 = arith.constant 0 : i32
    return %c0_i32, %c0_i32_0 : i32, i32
  }
  func.func @transform_3(%arg0: i32) -> (i32, i32) {
    %c0_i32 = arith.constant 0 : i32
    %c0_i32_0 = arith.constant 0 : i32
    return %arg0, %c0_i32 : i32, i32
  }
}

</mosaic_0001>

<bundles_post_ra>
// kernel: tpu_custom_call.1
= control target key start
LH: loop header
LB: loop body
LE: loop exit
PB: predicated region body
PF: predicated region fallthrough
CT: control target
= control target key end

     0   :  { %8 = vsyncpa [#allocation3], 0  ;;  %s627_s0 = inlined_call_operand.hbm [shape: f32[16,128], index: 0, kind: input, shape index: {}]   ;;  %s628_s1 = inlined_call_operand.vmem [shape: f32[1,128], index: 1, kind: input, shape index: {}]   ;;  %s629_s2 = inlined_call_operand.vmem [shape: f32[1,128], index: 2, kind: input, shape index: {}]   ;;  %s630_s3 = inlined_call_operand.hbm [shape: bf16[16,128], index: 3, kind: output, shape index: {}]  }
   0x1   :  { %10 = vsyncpa [#allocation3 + $0x1], 0 }
   0x2   :  { %11 = vsyncpa [#allocation4], 0 }
   0x3   :  { %13 = vsyncpa [#allocation4 + $0x1], 0  ;;  %s479_s12 = smov 0   ;;  %s481_s13 = smov 0  }
   0x4   :  { %s483_s14 = smov 0   ;;  %s485_s15 = smov 0  }
   0x5 LB: > { %s500_s16 = sadd.s32 4294967295, %s455_s15   ;;  %s301_s17 = sadd.s32 4294967294, %s455_s15   ;;  %s455_s15 = sphi %s485_s15, %s647_s15   ;;  %s451_s14 = sphi %s483_s14, %s646_s14   ;;  %s447_s13 = sphi %s481_s13, %s645_s13   ;;  %s443_s12 = sphi %s479_s12, %s644_s12  }
   0x6   : > { %s504_s18 = sadd.s32 1, %s455_s15   ;;  %s26_s19 = sadd.s32 1, %s451_s14 }
   0x7   : > { %s23_s20 = ssub.s32 %s455_s15, %s504_s18  ;;  %p33_p0 = scmp.ne.s32.totalorder %s451_s14, %s447_s13 }
   0x8   : > { %p24_p1 = scmp.eq.s32.totalorder %s23_s20, 0  ;;  %p34_p2 = scmp.eq.s32.totalorder %s455_s15, 0 }
   0x9   : > { %p39_p3 = scmp.ne.s32.totalorder %s447_s13, %s443_s12  ;;  %p40_p4 = scmp.eq.s32.totalorder %s500_s16, 0 }
   0xa   : > { %s516_s21 = scalar_select %p24_p1, %s451_s14, %s26_s19  }
   0xb   : > { %p518_p5 = por %p34_p2, %p33_p0  ;;  %p522_p6 = por %p40_p4, %p39_p3 }
   0xc   : > { %p105_p7 = scmp.eq.s32.totalorder %s500_s16, 1  ;;  %p111_p8 = scmp.eq.s32.totalorder %s301_s17, 1 }
   0xd   : > { %s634_s23 = scalar_select %p522_p6, 1, 0 }
   0xe   : > { %p327_p10 = scmp.lt.s32.totalorder %s455_s15, 2  ;;  %p529_p11 = por %p105_p7, %p33_p0 }
   0xf   : > { %p533_p12 = por %p111_p8, %p39_p3  ;;  %s137_s26 = sand.u32 1, %s451_s14  }
  0x10   : > { %s635_s24 = scalar_select %p529_p11, 1, 0 }
  0x11   : > { %s636_s25 = scalar_select %p533_p12, 1, 0 }
  0x12   : > { %s305_s27 = sshll.u32 %s455_s15, 7  ;;  %s304_s28 = sshll.u32 %s137_s26, 3 }
  0x13   : > { %s542_s4 = scalar_lea.hbm %s627_s0, %s305_s27  ;;  %s141_s5 = scalar_lea.vmem [#allocation2], %s304_s28 }
  0x14   : > { %s148_s6 = sshll.u32 %s141_s5, 4  ;;  %p546_p13 = pnand %p327_p10, %p518_p5  ;;  %s550_s6 = int_to_ptr.vmem [resolvable:$true] %s148_s6 }
  0x15   : > { %s138_s8 = scalar_lea.sflag [#allocation3], %s137_s26  ;;  %s363_s9 = scalar_lea.hbm %s542_s4, 128 }
  0x16   : > { %p364_p2 = scmp.ne.s32.totalorder %s542_s4, %s363_s9  ;;  %p365_p3 = pneg %p546_p13 }
  0x17   : > { %s368_s17 = scalar_lea.hbm %s627_s0, 256  ;;  %p369_p5 = scmp.lt.s32.totalorder %s542_s4, %s627_s0 }
  0x18   : > { %p366_p4 = pnand %p365_p3, %p364_p2  ;;  %p370_p8 = scmp.lt.s32.totalorder %s368_s17, %s363_s9 }
  0x1a   : > { %p367_p7 = pneg %p366_p4  ;;  %p371_p10 = por %p370_p8, %p369_p5 }
  0x1c   : > { %p372_p9 = pnand %p371_p10, %p367_p7 }
  0x1e   : > { %375 = shalt.err (!%p372_p9)
}
  0x1f   : > { %s376_s22 = scalar_lea.vmem %s550_s6, 128  ;;  %s457_s26 = smov [#allocation2]  }
  0x20   : > { %p377_p0 = scmp.ne.s32.totalorder %s550_s6, %s376_s22  ;;  %s381_s27 = sshll.u32 %s457_s26, 4  ;;  %s382_s27 = int_to_ptr.vmem [resolvable:$false] %s381_s27 }
  0x21   : > { %s383_s28 = scalar_lea.vmem %s382_s27, 256  ;;  %p384_p4 = scmp.lt.s32.totalorder %s550_s6, %s382_s27 }
  0x22   : > { %p379_p1 = pnand %p377_p0, %p365_p3  ;;  %p385_p12 = scmp.lt.s32.totalorder %s383_s28, %s376_s22 }
  0x24   : > { %p380_p2 = pneg %p379_p1  ;;  %p386_p11 = por %p385_p12, %p384_p4 }
  0x26   : > { %p387_p6 = pnand %p386_p11, %p380_p2 }
  0x28   : > { %390 = shalt.err (!%p387_p6)
}
  0x29   : > { %322 = dma.hbm_to_vmem [thread:$0]  (!%p546_p13), %s542_s4, 128, %s550_s6, %s138_s8  }
  0x2a   : > { %p638_p9 = scmp.lt.s32.totalorder %s455_s15, 3  ;;  %p639_p7 = scmp.ge.s32.totalorder %s455_s15, 1 }
  0x2c   : > { %p154_p0 = pnand %p639_p7, %p638_p9 }
  0x2d   : > { %s577_s29 = sand.u32 (!%p154_p0), 1, %s447_s13   ;;  %p640_p6 = scmp.ne.s32.totalorder (!%p154_p0), %s634_s23, 0 }
  0x2e   : > { %157 = sbr.rel (%p154_p0) target bundleno = 374 (0x176), region = 32  ;;  %s307_s30 = sshll.u32 (!%p154_p0), %s577_s29, 3 }
  0x2f   : > { %s160_s5 = scalar_lea.sflag (!%p154_p0), [#allocation3], %s577_s29  ;;  %s163_s9 = scalar_lea.vmem (!%p154_p0), [#allocation2], %s307_s30 }
  0x33   : > { %434 = dma.done.wait (%p640_p6), %s160_s5, 128  }
  0x34   : > { %436 = vsyncadd (%p640_p6), %s160_s5, 4294967168  ;;  %v186_v0 = vld [vmem:[%s163_s9] sm:$0xff]  ;;  %s308_s4 = sshll.u32 %s577_s29, 2  ;;  %s312_s10 = sshll.u32 %s500_s16, 6 }
  0x35   : > { %189 = vadd.xlane.f32.xlu0 %v186_v0  ;;  %v309_v9 = vld [vmem:[%s628_s1] ss:$0 sm:$0xff]  ;;  %s185_s11 = scalar_lea.vmem [#allocation5], %s308_s4  ;;  %s229_s22 = scalar_lea.hbm %s630_s3, %s312_s10 }
  0x36   : > { %v310_v11 = vld [vmem:[%s629_s2] ss:$0 sm:$0xff]  ;;  %s231_s17 = sshll.u32 %s185_s11, 4  ;;  %s218_s26 = scalar_lea.sflag [#allocation4], %s577_s29  ;;  %s232_s17 = int_to_ptr.vmem [resolvable:$true] %s231_s17 }
  0x37   : > { %s391_s27 = scalar_lea.vmem %s232_s17, 64  ;;  %p641_p12 = scmp.ne.s32.totalorder %s635_s24, 0 }
  0x38   : > { %p392_p11 = scmp.ne.s32.totalorder %s232_s17, %s391_s27  ;;  %s458_s28 = smov [#allocation5]  }
  0x39   : > { %s395_s30 = sshll.u32 %s458_s28, 4  ;;  %s396_s30 = int_to_ptr.vmem [resolvable:$false] %s395_s30 }
  0x3a   : > { %p393_p13 = pnand %p392_p11, %p641_p12  ;;  %s397_s16 = scalar_lea.vmem %s396_s30, 128 }
  0x3b   : > { %p398_p3 = scmp.lt.s32.totalorder %s232_s17, %s396_s30  ;;  %p399_p5 = scmp.lt.s32.totalorder %s397_s16, %s391_s27 }
  0x3c   : > { %p394_p1 = pneg %p393_p13 }
  0x3d   : > { %p400_p8 = por %p399_p5, %p398_p3 }
  0x3f   : > { %p401_p10 = pnand %p400_p8, %p394_p1 }
  0xbe   : > { %v190_v1 = vpop.xlane.xlu0 %189 }
  0xbf   : > { %v192_v2 = vmul.f32 0.0078125, %v190_v1 }
  0xc1   : > { %v193_v3 = vsub.f32 %v186_v0, %v192_v2 }
  0xc3   : > { %v194_v4 = vmul.f32 %v193_v3, %v193_v3 }
  0xc5   : > { %195 = vadd.xlane.f32.xlu0 %v194_v4 }
 0x14e   : > { %v196_v5 = vpop.xlane.xlu0 %195 }
 0x14f   : > { %v197_v6 = vmul.f32 0.0078125, %v196_v5 }
 0x151   : > { %v198_v7 = vadd.f32 1e-12, %v197_v6 }
 0x153   : > { %361 = vrsqrt.f32 %v198_v7 }
 0x160   : > { %v362_v8 = vpop.eup %361 }
 0x161   : > { %v200_v10 = vmul.f32 %v362_v8, %v193_v3 }
 0x163   : > { %v207_v12 = vmul.f32 %v309_v9, %v200_v10 }
 0x165   : > { %v214_v13 = vadd.f32 %v310_v11, %v207_v12 }
 0x167   : > { %v215_v14 = vpack.c.bf16 %v214_v13, %v214_v13 }
 0x169   : > { %216 = vst [vmem:[%s185_s11] sm:$0xf] %v215_v14 }
 0x16a   : > { %404 = shalt.err (!%p401_p10)
}
 0x16b   : > { %s405_s5 = scalar_lea.hbm %s229_s22, 64  ;;  %s409_s4 = scalar_lea.hbm %s630_s3, 128 }
 0x16c   : > { %p406_p2 = scmp.ne.s32.totalorder %s229_s22, %s405_s5  ;;  %p410_p7 = scmp.lt.s32.totalorder %s229_s22, %s630_s3 }
 0x16d   : > { %p411_p0 = scmp.lt.s32.totalorder %s409_s4, %s405_s5 }
 0x16e   : > { %p407_p4 = pnand %p406_p2, %p641_p12 }
 0x16f   : > { %p412_p6 = por %p411_p0, %p410_p7 }
 0x170   : > { %p408_p9 = pneg %p407_p4 }
 0x172   : > { %p413_p11 = pnand %p412_p6, %p408_p9 }
 0x174   : > { %416 = shalt.err (!%p413_p11)
}
 0x175   : > { %317 = dma.vmem_to_hbm [thread:$0]  (%p641_p12), %s232_s17, 64, %s229_s22, %s218_s26  }
 0x176 PF: > { %s243_s23 = sand.u32 1, %s443_s12   ;;  %p642_p13 = scmp.ne.s32.totalorder %s636_s25, 0 }
 0x177   : > { %p643_p1 = scmp.ge.s32.totalorder %s455_s15, 2  ;;  %s244_s8 = scalar_lea.sflag [#allocation4], %s243_s23 }
 0x179   : > { %p324_p3 = pnand %p643_p1, %p642_p13 }
 0x17b   : > { %p325_p5 = pneg %p324_p3 }
 0x17d   : > { %438 = dma.done.wait (%p325_p5), %s244_s8, 64  }
 0x17e   : > { %440 = vsyncadd (%p325_p5), %s244_s8, 4294967232  ;;  %p16_p8 = scmp.ge.s32.totalorder %s504_s18, 4   ;;  %s644_s12 = smov %s447_s13 }
 0x17f   : > { %s645_s13 = smov %s451_s14  ;;  %s646_s14 = smov %s516_s21 }
 0x180   : > { %s647_s15 = smov %s504_s18  ;;  %18 = sbr.rel (!%p16_p8) target bundleno = 5 (0x5), region = 77 }
 0x185   :  { %249 = vsyncpa [#allocation3], 1 }
 0x186   :  { %251 = vsyncpa [#allocation3 + $0x1], 1 }
 0x187   :  { %252 = vsyncpa [#allocation4], 1 }
 0x188   :  { %254 = vsyncpa [#allocation4 + $0x1], 1 }

</bundles_post_ra>
